<compile_context>
chip_gen: v5e
topology: v5e:2x2
jax: 0.10.0
libtpu: 0.0.40
codegen_flags: <defaults>
</compile_context>

<pallas_src>
import functools

import jax
import jax.numpy as jnp
from jax import lax
from jax.experimental import pallas as pl
from jax.experimental.pallas import tpu as pltpu


_CONTRACT_LAST = (((1,), (1,)), ((), ()))   # contract dim 1 of both operands


def _round_up(x, m):
    return (x + m - 1) // m * m


# --------------------------------------------------------------------------
# Kernel: one column tile of both HxH distance matrices.
# --------------------------------------------------------------------------
def _triplet_tile_kernel(lhs_ref, a_cols_ref, r_ref, c_ref, o_ref, *, margin):
    """Column tile j of the two pairwise-distance matrices.

    lhs_ref:    (H_pad, D) negatives (mm dtype), resident across all tiles.
    a_cols_ref: (TN, D)    anchor column tile (mm dtype), streamed.
    r_ref:      (H_pad, 1) f32, 0.5 * ||n_i||^2   (rows, mm-dtype-rounded).
    c_ref:      (2, TN)    f32, row 0 = 0.5*||n_j||^2, row 1 = 0.5*||a_j||^2.
    o_ref:      (2, TN)    f32, row 0 = max_i ||n_i - n_j||,
                                row 1 = relu(margin - min_i ||n_i - a_j||).
    """
    j = pl.program_id(0)
    tn = a_cols_ref.shape[0]

    lhs = lhs_ref[...]                                            # (H_pad, D)
    # Negative column tile = a row slice of the resident block (no extra DMA).
    n_cols = lhs_ref[pl.ds(pl.multiple_of(j * tn, tn), tn), :]    # (TN, D)
    a_cols = a_cols_ref[...]                                      # (TN, D)
    r = r_ref[...]                                                # (H_pad, 1)
    c = c_ref[...]                                                # (2, TN)

    # Gram matrices on the MXU, f32 accumulation; same contraction orientation
    # as attention's Q @ K^T (contract last dim of both) -- no in-kernel
    # transpose / relayout of either operand.
    g_nn = lax.dot_general(lhs, n_cols, _CONTRACT_LAST,
                           preferred_element_type=jnp.float32)    # (H_pad, TN)
    g_na = lax.dot_general(lhs, a_cols, _CONTRACT_LAST,
                           preferred_element_type=jnp.float32)    # (H_pad, TN)

    # 0.5*d^2[i,j] = r_i + c_j - g_ij.  Reduce over i first (only one
    # full-matrix add per Gram matrix), add c_j on the reduced (1, TN) row,
    # and only then apply the (monotonic) sqrt: 2*TN sqrts instead of
    # 2*H_pad*TN.
    m_nn = jnp.max(r - g_nn, axis=0, keepdims=True)               # (1, TN)
    m_na = jnp.min(r - g_na, axis=0, keepdims=True)               # (1, TN)

    n_d_max = jnp.sqrt(jnp.maximum(2.0 * (m_nn + c[0:1, :]), 0.0))
    a_d_min = jnp.sqrt(jnp.maximum(2.0 * (m_na + c[1:2, :]), 0.0))
    hinge = jnp.maximum(margin - a_d_min, 0.0)

    o_ref[0:1, :] = n_d_max
    o_ref[1:2, :] = hinge


# --------------------------------------------------------------------------
# Tiling / VMEM sizing.
# --------------------------------------------------------------------------
def _vmem_footprint(h_pad, d, tn, mm_itemsize, resident_bufs=2):
    # Resident operands (worst case: double-buffered if pl.Buffered(1) is
    # unavailable): lhs block + (H_pad, 1) row norms (minor dim lane-padded
    # to 128 in VMEM).
    resident = resident_bufs * (h_pad * d * mm_itemsize + h_pad * 128 * 4)
    # Streamed, double-buffered: anchor column tile + (2, TN) norms +
    # (2, TN) output (sublane-padded to 8 rows).
    streamed = 2 * (tn * d * mm_itemsize + 2 * 8 * tn * 4)
    # Two (H_pad, TN) f32 Gram matrices plus one temporary for r - g.
    grams = 3 * h_pad * tn * 4
    return resident + streamed + grams


def _select_tiling(h, d, mm_itemsize):
    # Physical VMEM of the current generation (64 MiB/TC on v7x, 128 MiB on
    # v5e/v6e); fall back to the most restrictive value if the query fails.
    try:
        phys = int(pltpu.get_tpu_info().vmem_capacity_bytes)
    except Exception:
        phys = 64 << 20
    budget = int(phys * 0.65)          # headroom for compiler scratch

    if h <= 512:
        tn = _round_up(h, 8)
        h_pad = tn
    else:
        best = None
        for cand in (1024, 512, 256, 128):
            h_pad_c = _round_up(h, cand)
            if _vmem_footprint(h_pad_c, d, cand, mm_itemsize) > budget:
                continue
            key = (h_pad_c, -cand)     # least padding first, then biggest tile
            if best is None or key < best[0]:
                best = (key, cand, h_pad_c)
        if best is None:
            # TODO(synk): add an inner row-tiled "arbitrary" reduction axis
            # (running (1, TN) max/min accumulators) so VMEM is bounded
            # independently of H for very large batches on v7x.
            tn = 128
            h_pad = _round_up(h, tn)
        else:
            tn, h_pad = best[1], best[2]

    footprint = _vmem_footprint(h_pad, d, tn, mm_itemsize)
    vmem_limit = int(min(max(footprint * 1.4 + (8 << 20), 32 << 20),
                         phys - (4 << 20)))
    return tn, h_pad, vmem_limit


def _build_call(*, h_pad, d, tn, num_tiles, margin, vmem_limit,
                single_buffer_resident):
    resident_kw = {}
    if single_buffer_resident and hasattr(pl, "Buffered"):
        # Constant index map -> one buffer is enough; reclaims H_pad*D bytes.
        resident_kw = dict(pipeline_mode=pl.Buffered(1))
    kernel = functools.partial(_triplet_tile_kernel, margin=margin)
    return pl.pallas_call(
        kernel,
        out_shape=jax.ShapeDtypeStruct((2, h_pad), jnp.float32),
        grid=(num_tiles,),
        in_specs=[
            pl.BlockSpec((h_pad, d), lambda j: (0, 0), **resident_kw),
            pl.BlockSpec((tn, d), lambda j: (j, 0)),
            pl.BlockSpec((h_pad, 1), lambda j: (0, 0), **resident_kw),
            pl.BlockSpec((2, tn), lambda j: (0, j)),
        ],
        out_specs=pl.BlockSpec((2, tn), lambda j: (0, j)),
        compiler_params=pltpu.CompilerParams(
            dimension_semantics=("parallel",),
            vmem_limit_bytes=vmem_limit),
    )


# --------------------------------------------------------------------------
# Wrapper (matches TripletLoss.forward).
# --------------------------------------------------------------------------
def triplet_loss(feats, margin=100.0, matmul_dtype=jnp.bfloat16):
    """feats: (bs, D). Returns scalar f32 loss matching TripletLoss.forward.

    matmul_dtype=jnp.bfloat16 is the production path; float32 is kept only
    for validation (multi-pass and much slower on the v5e/v6e MXU).
    """
    feats = jnp.asarray(feats, jnp.float32)
    bs, d = feats.shape
    if bs % 2 != 0:
        raise ValueError("TripletLoss requires an even batch size.")
    h = bs // 2

    mm_itemsize = jnp.dtype(matmul_dtype).itemsize
    tn, h_pad, vmem_limit = _select_tiling(h, d, mm_itemsize)
    num_tiles = h_pad // tn

    n_half = feats[:h]
    a_half = feats[h:]
    if h_pad != h:
        # Pad by repeating the last valid row: padded *rows* are harmless
        # duplicates in the max/min over i, and padded *columns* are dropped
        # by the wrapper-side [:h] reduction -- no in-kernel masking at all.
        pad = h_pad - h
        n_half = jnp.concatenate(
            [n_half, jnp.broadcast_to(n_half[h - 1:h], (pad, d))], axis=0)
        a_half = jnp.concatenate(
            [a_half, jnp.broadcast_to(a_half[h - 1:h], (pad, d))], axis=0)

    # Pre-cast the MXU operands once (no per-step casts, bf16 resident block).
    lhs = n_half.astype(matmul_dtype)       # resident rows / negative columns
    a_cols = a_half.astype(matmul_dtype)    # streamed anchor columns

    # Precompute 0.5 * squared norms once.  Computing them from the
    # mm-dtype-rounded values keeps r + c - g consistent with the Gram
    # matrices (mitigates cancellation for near-duplicate rows).
    nq = lhs.astype(jnp.float32)
    aq = a_cols.astype(jnp.float32)
    rn = jnp.sum(nq * nq, axis=1)                                    # (H_pad,)
    ra = jnp.sum(aq * aq, axis=1)                                    # (H_pad,)
    r_half = (0.5 * rn)[:, None]                                     # (H_pad, 1)
    c_half = 0.5 * jnp.stack([rn, ra], axis=0)                       # (2, H_pad)

    args = (lhs, a_cols, r_half, c_half)
    call_kwargs = dict(h_pad=h_pad, d=d, tn=tn, num_tiles=num_tiles,
                       margin=float(margin), vmem_limit=vmem_limit)
    try:
        out = _build_call(single_buffer_resident=True, **call_kwargs)(*args)
    except Exception:
        # pl.Buffered(1) (single-buffered resident inputs) not supported on
        # this jax build -- fall back to default double buffering.
        out = _build_call(single_buffer_resident=False, **call_kwargs)(*args)

    # Tiny second reduction pass: both means are over the H valid columns,
    # so loss = (sum row 0 + sum row 1) / H.
    return jnp.sum(out[:, :h]) / jnp.float32(h)


# --------------------------------------------------------------------------
# Pure-JAX reference (mirrors the PyTorch module).
# --------------------------------------------------------------------------
def _reference(feats, margin=100.0):
    bs = feats.shape[0]
    h = bs // 2
    n, a = feats[:h], feats[h:]
    n_d = jnp.sqrt(jnp.maximum(
        jnp.sum((n[:, None, :] - n[None, :, :]) ** 2, axis=-1), 0.0))
    a_d = jnp.sqrt(jnp.maximum(
        jnp.sum((n[:, None, :] - a[None, :, :]) ** 2, axis=-1), 0.0))
    n_d_max = jnp.max(n_d, axis=0)
    a_d_min = jnp.min(a_d, axis=0)
    hinge = jnp.maximum(margin - a_d_min, 0.0)
    return jnp.mean(n_d_max) + jnp.mean(hinge)


if __name__ == "__main__":
    key = jax.random.PRNGKey(0)
    bs, dim = 8, 32  # small: batch=8 feature vectors of hidden=32
    feats = jax.random.normal(key, (bs, dim), dtype=jnp.float32)

    ref = jax.block_until_ready(_reference(feats, margin=100.0))

    # f32 MXU path (validation only).
    loss_f32 = jax.block_until_ready(
        triplet_loss(feats, margin=100.0, matmul_dtype=jnp.float32))
    assert jnp.allclose(loss_f32, ref, rtol=2e-3, atol=2e-2), (loss_f32, ref)

    # Default bf16 MXU path (production; looser tolerance for bf16 Gram).
    loss_bf16 = jax.block_until_ready(triplet_loss(feats, margin=100.0))
    assert jnp.allclose(loss_bf16, ref, rtol=5e-3, atol=5e-2), (loss_bf16, ref)

    print("KERNEL_OK")
</pallas_src>

<mosaic_0001>
module attributes {stable_mosaic.version = 11 : i64} {
  func.func @_triplet_tile_kernel(%arg0: i32, %arg1: memref<8x32xf32, #tpu.memory_space<vmem>>, %arg2: memref<8x32xf32, #tpu.memory_space<vmem>>, %arg3: memref<8x1xf32, #tpu.memory_space<vmem>>, %arg4: memref<2x8xf32, #tpu.memory_space<vmem>>, %arg5: memref<2x8xf32, #tpu.memory_space<vmem>>) attributes {dimension_semantics = [#tpu.dimension_semantics<parallel>], iteration_bounds = array<i64: 1>, scalar_prefetch = 0 : i64, scratch_operands = 0 : i64, tpu.core_type = #tpu.core_type<tc>, window_params = [{pipeline_mode = #tpu.pipeline_mode<synchronous>, transform_indices = @transform_0, window_bounds = array<i64: 8, 32>}, {transform_indices = @transform_1, window_bounds = array<i64: 8, 32>}, {pipeline_mode = #tpu.pipeline_mode<synchronous>, transform_indices = @transform_2, window_bounds = array<i64: 8, 1>}, {transform_indices = @transform_3, window_bounds = array<i64: 2, 8>}, {transform_indices = @transform_4, window_bounds = array<i64: 2, 8>}]} {
    %c0 = arith.constant 0 : index
    %c0_0 = arith.constant 0 : index
    %0 = vector.load %arg1[%c0, %c0_0] : memref<8x32xf32, #tpu.memory_space<vmem>>, vector<8x32xf32>
    %c8_i32 = arith.constant 8 : i32
    %1 = arith.muli %arg0, %c8_i32 : i32
    %2 = tpu.assume_multiple %1, 8 : i32
    %3 = arith.index_cast %2 : i32 to index
    %c0_1 = arith.constant 0 : index
    %4 = vector.load %arg1[%3, %c0_1] : memref<8x32xf32, #tpu.memory_space<vmem>>, vector<8x32xf32>
    %c0_2 = arith.constant 0 : index
    %c0_3 = arith.constant 0 : index
    %5 = vector.load %arg2[%c0_2, %c0_3] : memref<8x32xf32, #tpu.memory_space<vmem>>, vector<8x32xf32>
    %c0_4 = arith.constant 0 : index
    %c0_5 = arith.constant 0 : index
    %6 = vector.load %arg3[%c0_4, %c0_5] : memref<8x1xf32, #tpu.memory_space<vmem>>, vector<8x1xf32>
    %c0_6 = arith.constant 0 : index
    %c0_7 = arith.constant 0 : index
    %7 = vector.load %arg4[%c0_6, %c0_7] : memref<2x8xf32, #tpu.memory_space<vmem>>, vector<2x8xf32>
    %cst = arith.constant dense<0.000000e+00> : vector<8x8xf32>
    %8 = tpu.matmul %0, %4, %cst {dimension_numbers = #tpu.dot_dimension_numbers<[1], [1], [0], [0], [0, 0, 1, 0], [], []>} : vector<8x32xf32>, vector<8x32xf32>, vector<8x8xf32> -> vector<8x8xf32>
    %cst_8 = arith.constant dense<0.000000e+00> : vector<8x8xf32>
    %9 = tpu.matmul %0, %5, %cst_8 {dimension_numbers = #tpu.dot_dimension_numbers<[1], [1], [0], [0], [0, 0, 1, 0], [], []>} : vector<8x32xf32>, vector<8x32xf32>, vector<8x8xf32> -> vector<8x8xf32>
    %10 = vector.broadcast %6 : vector<8x1xf32> to vector<8x8xf32>
    %11 = arith.subf %10, %8 : vector<8x8xf32>
    %cst_9 = arith.constant dense<0xFF800000> : vector<8xf32>
    %12 = vector.multi_reduction <maximumf>, %11, %cst_9 [0] : vector<8x8xf32> to vector<8xf32>
    %13 = vector.shape_cast %12 : vector<8xf32> to vector<1x8xf32>
    %14 = vector.broadcast %6 : vector<8x1xf32> to vector<8x8xf32>
    %15 = arith.subf %14, %9 : vector<8x8xf32>
    %cst_10 = arith.constant dense<0x7F800000> : vector<8xf32>
    %16 = vector.multi_reduction <minimumf>, %15, %cst_10 [0] : vector<8x8xf32> to vector<8xf32>
    %17 = vector.shape_cast %16 : vector<8xf32> to vector<1x8xf32>
    %18 = vector.extract_strided_slice %7 {offsets = [0, 0], sizes = [1, 8], strides = [1, 1]} : vector<2x8xf32> to vector<1x8xf32>
    %19 = arith.addf %13, %18 : vector<1x8xf32>
    %cst_11 = arith.constant 2.000000e+00 : f32
    %20 = vector.broadcast %cst_11 : f32 to vector<1x8xf32>
    %21 = arith.mulf %20, %19 : vector<1x8xf32>
    %cst_12 = arith.constant 0.000000e+00 : f32
    %22 = vector.broadcast %cst_12 : f32 to vector<1x8xf32>
    %23 = arith.maximumf %21, %22 : vector<1x8xf32>
    %24 = math.sqrt %23 : vector<1x8xf32>
    %25 = vector.extract_strided_slice %7 {offsets = [1, 0], sizes = [1, 8], strides = [1, 1]} : vector<2x8xf32> to vector<1x8xf32>
    %26 = arith.addf %17, %25 : vector<1x8xf32>
    %cst_13 = arith.constant 2.000000e+00 : f32
    %27 = vector.broadcast %cst_13 : f32 to vector<1x8xf32>
    %28 = arith.mulf %27, %26 : vector<1x8xf32>
    %cst_14 = arith.constant 0.000000e+00 : f32
    %29 = vector.broadcast %cst_14 : f32 to vector<1x8xf32>
    %30 = arith.maximumf %28, %29 : vector<1x8xf32>
    %31 = math.sqrt %30 : vector<1x8xf32>
    %cst_15 = arith.constant 1.000000e+02 : f32
    %32 = vector.broadcast %cst_15 : f32 to vector<1x8xf32>
    %33 = arith.subf %32, %31 : vector<1x8xf32>
    %cst_16 = arith.constant 0.000000e+00 : f32
    %34 = vector.broadcast %cst_16 : f32 to vector<1x8xf32>
    %35 = arith.maximumf %33, %34 : vector<1x8xf32>
    %c0_17 = arith.constant 0 : index
    %c0_18 = arith.constant 0 : index
    %36 = vector.load %arg5[%c0_17, %c0_18] : memref<2x8xf32, #tpu.memory_space<vmem>>, vector<1x8xf32>
    tpu.vector_store %arg5[%c0_17, %c0_18], %24 {strides = array<i32>} : memref<2x8xf32, #tpu.memory_space<vmem>>, vector<1x8xf32>,
    %c1 = arith.constant 1 : index
    %c0_19 = arith.constant 0 : index
    %37 = vector.load %arg5[%c1, %c0_19] : memref<2x8xf32, #tpu.memory_space<vmem>>, vector<1x8xf32>
    tpu.vector_store %arg5[%c1, %c0_19], %35 {strides = array<i32>} : memref<2x8xf32, #tpu.memory_space<vmem>>, vector<1x8xf32>,
    return
  }
  func.func @transform_0(%arg0: i32) -> (i32, i32) {
    %c0_i32 = arith.constant 0 : i32
    %c0_i32_0 = arith.constant 0 : i32
    %c0_i32_1 = arith.constant 0 : i32
    return %c0_i32, %c0_i32_0 : i32, i32
  }
  func.func @transform_1(%arg0: i32) -> (i32, i32) {
    %c0_i32 = arith.constant 0 : i32
    %c0_i32_0 = arith.constant 0 : i32
    return %arg0, %c0_i32 : i32, i32
  }
  func.func @transform_2(%arg0: i32) -> (i32, i32) {
    %c0_i32 = arith.constant 0 : i32
    %c0_i32_0 = arith.constant 0 : i32
    %c0_i32_1 = arith.constant 0 : i32
    return %c0_i32, %c0_i32_0 : i32, i32
  }
  func.func @transform_3(%arg0: i32) -> (i32, i32) {
    %c0_i32 = arith.constant 0 : i32
    %c0_i32_0 = arith.constant 0 : i32
    return %c0_i32, %arg0 : i32, i32
  }
  func.func @transform_4(%arg0: i32) -> (i32, i32) {
    %c0_i32 = arith.constant 0 : i32
    %c0_i32_0 = arith.constant 0 : i32
    return %c0_i32, %arg0 : i32, i32
  }
}

module attributes {stable_mosaic.version = 11 : i64} {
  func.func @_triplet_tile_kernel(%arg0: i32, %arg1: memref<8x32xf32, #tpu.memory_space<vmem>>, %arg2: memref<8x32xf32, #tpu.memory_space<vmem>>, %arg3: memref<8x1xf32, #tpu.memory_space<vmem>>, %arg4: memref<2x8xf32, #tpu.memory_space<vmem>>, %arg5: memref<2x8xf32, #tpu.memory_space<vmem>>) attributes {dimension_semantics = [#tpu.dimension_semantics<parallel>], iteration_bounds = array<i64: 1>, scalar_prefetch = 0 : i64, scratch_operands = 0 : i64, tpu.core_type = #tpu.core_type<tc>, window_params = [{pipeline_mode = #tpu.pipeline_mode<synchronous>, transform_indices = @transform_0, window_bounds = array<i64: 8, 32>}, {transform_indices = @transform_1, window_bounds = array<i64: 8, 32>}, {pipeline_mode = #tpu.pipeline_mode<synchronous>, transform_indices = @transform_2, window_bounds = array<i64: 8, 1>}, {transform_indices = @transform_3, window_bounds = array<i64: 2, 8>}, {transform_indices = @transform_4, window_bounds = array<i64: 2, 8>}]} {
    %c0 = arith.constant 0 : index
    %c0_0 = arith.constant 0 : index
    %0 = vector.load %arg1[%c0, %c0_0] : memref<8x32xf32, #tpu.memory_space<vmem>>, vector<8x32xf32>
    %c8_i32 = arith.constant 8 : i32
    %1 = arith.muli %arg0, %c8_i32 : i32
    %2 = tpu.assume_multiple %1, 8 : i32
    %3 = arith.index_cast %2 : i32 to index
    %c0_1 = arith.constant 0 : index
    %4 = vector.load %arg1[%3, %c0_1] : memref<8x32xf32, #tpu.memory_space<vmem>>, vector<8x32xf32>
    %c0_2 = arith.constant 0 : index
    %c0_3 = arith.constant 0 : index
    %5 = vector.load %arg2[%c0_2, %c0_3] : memref<8x32xf32, #tpu.memory_space<vmem>>, vector<8x32xf32>
    %c0_4 = arith.constant 0 : index
    %c0_5 = arith.constant 0 : index
    %6 = vector.load %arg3[%c0_4, %c0_5] : memref<8x1xf32, #tpu.memory_space<vmem>>, vector<8x1xf32>
    %c0_6 = arith.constant 0 : index
    %c0_7 = arith.constant 0 : index
    %7 = vector.load %arg4[%c0_6, %c0_7] : memref<2x8xf32, #tpu.memory_space<vmem>>, vector<2x8xf32>
    %cst = arith.constant dense<0.000000e+00> : vector<8x8xf32>
    %8 = tpu.matmul %0, %4, %cst {dimension_numbers = #tpu.dot_dimension_numbers<[1], [1], [0], [0], [0, 0, 1, 0], [], []>} : vector<8x32xf32>, vector<8x32xf32>, vector<8x8xf32> -> vector<8x8xf32>
    %cst_8 = arith.constant dense<0.000000e+00> : vector<8x8xf32>
    %9 = tpu.matmul %0, %5, %cst_8 {dimension_numbers = #tpu.dot_dimension_numbers<[1], [1], [0], [0], [0, 0, 1, 0], [], []>} : vector<8x32xf32>, vector<8x32xf32>, vector<8x8xf32> -> vector<8x8xf32>
    %10 = vector.broadcast %6 : vector<8x1xf32> to vector<8x8xf32>
    %11 = arith.subf %10, %8 : vector<8x8xf32>
    %cst_9 = arith.constant dense<0xFF800000> : vector<8xf32>
    %12 = vector.multi_reduction <maximumf>, %11, %cst_9 [0] : vector<8x8xf32> to vector<8xf32>
    %13 = vector.shape_cast %12 : vector<8xf32> to vector<1x8xf32>
    %14 = vector.broadcast %6 : vector<8x1xf32> to vector<8x8xf32>
    %15 = arith.subf %14, %9 : vector<8x8xf32>
    %cst_10 = arith.constant dense<0x7F800000> : vector<8xf32>
    %16 = vector.multi_reduction <minimumf>, %15, %cst_10 [0] : vector<8x8xf32> to vector<8xf32>
    %17 = vector.shape_cast %16 : vector<8xf32> to vector<1x8xf32>
    %18 = vector.extract_strided_slice %7 {offsets = [0, 0], sizes = [1, 8], strides = [1, 1]} : vector<2x8xf32> to vector<1x8xf32>
    %19 = arith.addf %13, %18 : vector<1x8xf32>
    %cst_11 = arith.constant 2.000000e+00 : f32
    %20 = vector.broadcast %cst_11 : f32 to vector<1x8xf32>
    %21 = arith.mulf %20, %19 : vector<1x8xf32>
    %cst_12 = arith.constant 0.000000e+00 : f32
    %22 = vector.broadcast %cst_12 : f32 to vector<1x8xf32>
    %23 = arith.maximumf %21, %22 : vector<1x8xf32>
    %24 = math.sqrt %23 : vector<1x8xf32>
    %25 = vector.extract_strided_slice %7 {offsets = [1, 0], sizes = [1, 8], strides = [1, 1]} : vector<2x8xf32> to vector<1x8xf32>
    %26 = arith.addf %17, %25 : vector<1x8xf32>
    %cst_13 = arith.constant 2.000000e+00 : f32
    %27 = vector.broadcast %cst_13 : f32 to vector<1x8xf32>
    %28 = arith.mulf %27, %26 : vector<1x8xf32>
    %cst_14 = arith.constant 0.000000e+00 : f32
    %29 = vector.broadcast %cst_14 : f32 to vector<1x8xf32>
    %30 = arith.maximumf %28, %29 : vector<1x8xf32>
    %31 = math.sqrt %30 : vector<1x8xf32>
    %cst_15 = arith.constant 1.000000e+02 : f32
    %32 = vector.broadcast %cst_15 : f32 to vector<1x8xf32>
    %33 = arith.subf %32, %31 : vector<1x8xf32>
    %cst_16 = arith.constant 0.000000e+00 : f32
    %34 = vector.broadcast %cst_16 : f32 to vector<1x8xf32>
    %35 = arith.maximumf %33, %34 : vector<1x8xf32>
    %c0_17 = arith.constant 0 : index
    %c0_18 = arith.constant 0 : index
    %36 = vector.load %arg5[%c0_17, %c0_18] : memref<2x8xf32, #tpu.memory_space<vmem>>, vector<1x8xf32>
    tpu.vector_store %arg5[%c0_17, %c0_18], %24 {strides = array<i32>} : memref<2x8xf32, #tpu.memory_space<vmem>>, vector<1x8xf32>,
    %c1 = arith.constant 1 : index
    %c0_19 = arith.constant 0 : index
    %37 = vector.load %arg5[%c1, %c0_19] : memref<2x8xf32, #tpu.memory_space<vmem>>, vector<1x8xf32>
    tpu.vector_store %arg5[%c1, %c0_19], %35 {strides = array<i32>} : memref<2x8xf32, #tpu.memory_space<vmem>>, vector<1x8xf32>,
    return
  }
  func.func @transform_0(%arg0: i32) -> (i32, i32) {
    %c0_i32 = arith.constant 0 : i32
    %c0_i32_0 = arith.constant 0 : i32
    %c0_i32_1 = arith.constant 0 : i32
    return %c0_i32, %c0_i32_0 : i32, i32
  }
  func.func @transform_1(%arg0: i32) -> (i32, i32) {
    %c0_i32 = arith.constant 0 : i32
    %c0_i32_0 = arith.constant 0 : i32
    return %arg0, %c0_i32 : i32, i32
  }
  func.func @transform_2(%arg0: i32) -> (i32, i32) {
    %c0_i32 = arith.constant 0 : i32
    %c0_i32_0 = arith.constant 0 : i32
    %c0_i32_1 = arith.constant 0 : i32
    return %c0_i32, %c0_i32_0 : i32, i32
  }
  func.func @transform_3(%arg0: i32) -> (i32, i32) {
    %c0_i32 = arith.constant 0 : i32
    %c0_i32_0 = arith.constant 0 : i32
    return %c0_i32, %arg0 : i32, i32
  }
  func.func @transform_4(%arg0: i32) -> (i32, i32) {
    %c0_i32 = arith.constant 0 : i32
    %c0_i32_0 = arith.constant 0 : i32
    return %c0_i32, %arg0 : i32, i32
  }
}

</mosaic_0001>

<bundles_post_ra>
// kernel: tpu_custom_call.1
= control target key start
LH: loop header
LB: loop body
LE: loop exit
PB: predicated region body
PF: predicated region fallthrough
CT: control target
= control target key end

     0   :  { %9 = vsyncpa [#allocation3], 0  ;;  %s314_s0 = inlined_call_operand.vmem [shape: f32[8,32], index: 0, kind: input, shape index: {}]   ;;  %s315_s1 = inlined_call_operand.hbm [shape: f32[8,32], index: 1, kind: input, shape index: {}]   ;;  %s316_s2 = inlined_call_operand.vmem [shape: f32[8,1], index: 2, kind: input, shape index: {}]   ;;  %s317_s3 = inlined_call_operand.hbm [shape: f32[2,8], index: 3, kind: input, shape index: {}]   ;;  %s318_s4 = inlined_call_operand.hbm [shape: f32[2,8], index: 4, kind: output, shape index: {}]  }
   0x1   :  { %10 = vsyncpa [#allocation6], 0 }
   0x2   :  { %11 = vsyncpa [#allocation4], 0  ;;  %s19_s17 = sshll.u32 %s315_s1, 4  ;;  %s270_s18 = smov [#allocation2]   ;;  %s20_s17 = int_to_ptr.hbm [resolvable:$true] %s19_s17 }
   0x3   :  { %s21_s19 = sshll.u32 %s270_s18, 4  ;;  %s32_s22 = sshll.u32 %s317_s3, 4  ;;  %s22_s19 = int_to_ptr.vmem [resolvable:$true] %s21_s19  ;;  %s33_s22 = int_to_ptr.hbm [resolvable:$true] %s32_s22 }
   0x4   :  { %24 = dma.hbm_to_vmem [thread:$0]  %s20_s17, 128, %s22_s19, [#allocation3]  }
   0x5   :  { %s271_s23 = smov [#allocation5]  }
   0x6   :  { %s34_s24 = sshll.u32 %s271_s23, 4  ;;  %s35_s24 = int_to_ptr.vmem [resolvable:$true] %s34_s24 }
   0x7   :  { %37 = dma.hbm_to_vmem [thread:$0]  %s33_s22, 32, %s35_s24, [#allocation6]  }
   0x8   :  { %264 = dma.done.wait [#allocation3], 128  }
   0x9   :  { %265 = vsyncadd [#allocation3], 4294967168 }
   0xa   :  { %266 = dma.done.wait [#allocation6], 32  }
   0xb   :  { %267 = vsyncadd [#allocation6], 4294967264  ;;  %v272_v0 = vmov 0   ;;  %vm53_vm0 = vcmask 261120   ;;  %v49_v1 = vld [vmem:[%s314_s0] sm:$0xff]  ;;  %vm109_vm1 = vcmask 64512  }
   0xc   :  { %187 = vset.pattern.permute.xlu0 %v272_v0  ;;  %v50_v2 = vld [vmem:[#allocation2] sm:$0xff]  ;;  %179 = vmatpush.xpose.msk.msra.mxu0 %vm53_vm0, %v49_v1  ;;  %v52_v21 = vld [vmem:[#allocation5] sm:$0x3]  ;;  %vm157_vm3 = vcmask 57344   ;;  %s273_s0 = smov [#allocation7]   ;;  %s168_s29 = sshll.u32 %s318_s4, 4  ;;  %s169_s29 = int_to_ptr.hbm [resolvable:$true] %s168_s29 }
   0xd   :  { %v51_v3 = vld [vmem:[%s316_s2] sm:$0xff]  ;;  %181 = vmatpush.xpose.msk.msra.mxu1 %vm53_vm0, %v50_v2  ;;  %s166_s2 = sshll.u32 %s273_s0, 4  ;;  %vm159_vm7 = vcmask 58369   ;;  %s167_s2 = int_to_ptr.vmem [resolvable:$true] %s166_s2 }
   0xe   :  { %105 = vperm.xlu0 %187, %v51_v3  }
   0xf   :  { %180 = vmatmul.msk.f32.vlgmr.msra.gmra.mxu0 %vm53_vm0, %v49_v1 }
  0x10   :  { %182 = vmatmul.msk.f32.vlgmr.msra.gmra.mxu1 %vm53_vm0, %v49_v1 }
  0x80   :  { %v106_v4 = vpop.permute.xlu0 %105 }
  0x8c   :  { %v77_v5 = vpop.f32.mrf.mxu0 }
  0x8d   :  { %v100_v6 = vpop.f32.mrf.mxu1  ;;  %v108_v7 = vsub.f32 %v106_v4, %v77_v5 }
  0x8e   :  { %v117_v8 = vsub.f32 %v106_v4, %v100_v6 }
  0x8f   :  { %v110_v9 = vsel %vm109_vm1, %v108_v7, -inf }
  0x90   :  { %v118_v10 = vsel %vm109_vm1, %v117_v8, inf  ;;  %v111_v11 = vrot.slane %v110_v9, 4 }
  0x91   :  { %v119_v12 = vrot.slane %v118_v10, 4 }
  0x92   :  { %v112_v13 = vmax.f32 %v110_v9, %v111_v11 }
  0x93   :  { %v120_v14 = vmin.f32 %v118_v10, %v119_v12 }
  0x94   :  { %v113_v15 = vrot.slane %v112_v13, 2 }
  0x95   :  { %v121_v16 = vrot.slane %v120_v14, 2 }
  0x96   :  { %v114_v17 = vmax.f32 %v112_v13, %v113_v15 }
  0x97   :  { %v122_v18 = vmin.f32 %v120_v14, %v121_v16 }
  0x98   :  { %v115_v19 = vrot.slane %v114_v17, 1 }
  0x99   :  { %v123_v20 = vrot.slane %v122_v18, 1 }
  0x9a   :  { %v116_v22 = vmax.f32 %v114_v17, %v115_v19 }
  0x9b   :  { %v124_v23 = vmin.f32 %v122_v18, %v123_v20 }
  0x9c   :  { %v125_v24 = vadd.f32 %v116_v22, %v52_v21 }
  0x9d   :  { %v140_v25 = vadd.f32 %v124_v23, %v52_v21 }
  0x9e   :  { %v126_v26 = vmul.f32 2.0, %v125_v24 }
  0x9f   :  { %v141_v27 = vmul.f32 2.0, %v140_v25 }
  0xa0   :  { %v127_v28 = vmax.f32 %v126_v26, 0.0 }
  0xa1   :  { %v142_v29 = vmax.f32 %v141_v27, 0.0 }
  0xa2   :  { %vm135_vm4 = vcmp.eq.f32.partialorder %v127_v28, inf  ;;  %v138_v45 = vand.u32 2147483648, %v127_v28  ;;  %vm137_vm6 = vcmp.eq.f32.partialorder %v127_v28, 0.0 }
  0xa3   :  { %188 = vrsqrt.f32 %v142_v29  ;;  %vm150_vm2 = vcmp.eq.f32.partialorder %v142_v29, inf  ;;  %v153_v44 = vand.u32 2147483648, %v142_v29  ;;  %vm152_vm5 = vcmp.eq.f32.partialorder %v142_v29, 0.0 }
  0xa4   :  { %190 = vrsqrt.f32 %v127_v28 }
  0xa9   :  { %v189_v30 = vpop.eup %188 }
  0xaa   :  { %v191_v31 = vpop.eup %190  ;;  %v144_v32 = vmul.f32 %v189_v30, %v142_v29 }
  0xab   :  { %v129_v33 = vmul.f32 %v191_v31, %v127_v28 }
  0xac   :  { %v145_v34 = vmul.f32 %v189_v30, %v144_v32 }
  0xad   :  { %v130_v35 = vmul.f32 %v191_v31, %v129_v33 }
  0xae   :  { %v146_v36 = vmul.f32 0.5, %v145_v34 }
  0xaf   :  { %v131_v37 = vmul.f32 0.5, %v130_v35 }
  0xb0   :  { %v147_v38 = vsub.f32 1.5, %v146_v36 }
  0xb1   :  { %v132_v39 = vsub.f32 1.5, %v131_v37 }
  0xb2   :  { %v148_v40 = vmul.f32 %v189_v30, %v147_v38 }
  0xb3   :  { %v133_v41 = vmul.f32 %v191_v31, %v132_v39 }
  0xb4   :  { %v149_v42 = vmul.f32 %v148_v40, %v142_v29 }
  0xb5   :  { %v134_v43 = vmul.f32 %v133_v41, %v127_v28 }
  0xb6   :  { %v151_v46 = vsel %vm150_vm2, %v142_v29, %v149_v42 }
  0xb7   :  { %v136_v47 = vsel %vm135_vm4, %v127_v28, %v134_v43  ;;  %v154_v48 = vsel %vm152_vm5, %v153_v44, %v151_v46 }
  0xb8   :  { %v139_v49 = vsel %vm137_vm6, %v138_v45, %v136_v47  ;;  %v155_v50 = vsub.f32 100.0, %v154_v48 }
  0xb9   :  { %158 = vst.msk [vmem:[#allocation7] sm:$0x1] %vm157_vm3, %v139_v49 }
  0xba   :  { %v156_v51 = vmax.f32 %v155_v50, 0.0 }
  0xbc   :  { %160 = vst.msk [vmem:[#allocation7] sm:$0x2] %vm159_vm7, %v156_v51 }
  0xbd   :  { %171 = dma.vmem_to_hbm [thread:$0]  %s167_s2, 32, %s169_s29, [#allocation4]  }
  0xbe   :  { %268 = dma.done.wait [#allocation4], 32  }
  0xbf   :  { %269 = vsyncadd [#allocation4], 4294967264 }
  0xc0   :  { %176 = vsyncpa [#allocation3], 1 }
  0xc1   :  { %177 = vsyncpa [#allocation6], 1 }
  0xc2   :  { %178 = vsyncpa [#allocation4], 1 }

// kernel: tpu_custom_call.1
= control target key start
LH: loop header
LB: loop body
LE: loop exit
PB: predicated region body
PF: predicated region fallthrough
CT: control target
= control target key end

     0   :  { %9 = vsyncpa [#allocation3], 0  ;;  %s314_s0 = inlined_call_operand.vmem [shape: f32[8,32], index: 0, kind: input, shape index: {}]   ;;  %s315_s1 = inlined_call_operand.hbm [shape: f32[8,32], index: 1, kind: input, shape index: {}]   ;;  %s316_s2 = inlined_call_operand.vmem [shape: f32[8,1], index: 2, kind: input, shape index: {}]   ;;  %s317_s3 = inlined_call_operand.hbm [shape: f32[2,8], index: 3, kind: input, shape index: {}]   ;;  %s318_s4 = inlined_call_operand.hbm [shape: f32[2,8], index: 4, kind: output, shape index: {}]  }
   0x1   :  { %10 = vsyncpa [#allocation6], 0 }
   0x2   :  { %11 = vsyncpa [#allocation4], 0  ;;  %s19_s17 = sshll.u32 %s315_s1, 4  ;;  %s270_s18 = smov [#allocation2]   ;;  %s20_s17 = int_to_ptr.hbm [resolvable:$true] %s19_s17 }
   0x3   :  { %s21_s19 = sshll.u32 %s270_s18, 4  ;;  %s32_s22 = sshll.u32 %s317_s3, 4  ;;  %s22_s19 = int_to_ptr.vmem [resolvable:$true] %s21_s19  ;;  %s33_s22 = int_to_ptr.hbm [resolvable:$true] %s32_s22 }
   0x4   :  { %24 = dma.hbm_to_vmem [thread:$0]  %s20_s17, 128, %s22_s19, [#allocation3]  }
   0x5   :  { %s271_s23 = smov [#allocation5]  }
   0x6   :  { %s34_s24 = sshll.u32 %s271_s23, 4  ;;  %s35_s24 = int_to_ptr.vmem [resolvable:$true] %s34_s24 }
   0x7   :  { %37 = dma.hbm_to_vmem [thread:$0]  %s33_s22, 32, %s35_s24, [#allocation6]  }
   0x8   :  { %264 = dma.done.wait [#allocation3], 128  }
   0x9   :  { %265 = vsyncadd [#allocation3], 4294967168 }
   0xa   :  { %266 = dma.done.wait [#allocation6], 32  }
   0xb   :  { %267 = vsyncadd [#allocation6], 4294967264  ;;  %v272_v0 = vmov 0   ;;  %vm53_vm0 = vcmask 261120   ;;  %v49_v1 = vld [vmem:[%s314_s0] sm:$0xff]  ;;  %vm109_vm1 = vcmask 64512  }
   0xc   :  { %187 = vset.pattern.permute.xlu0 %v272_v0  ;;  %v50_v2 = vld [vmem:[#allocation2] sm:$0xff]  ;;  %179 = vmatpush.xpose.msk.msra.mxu0 %vm53_vm0, %v49_v1  ;;  %v52_v21 = vld [vmem:[#allocation5] sm:$0x3]  ;;  %vm157_vm3 = vcmask 57344   ;;  %s273_s0 = smov [#allocation7]   ;;  %s168_s29 = sshll.u32 %s318_s4, 4  ;;  %s169_s29 = int_to_ptr.hbm [resolvable:$true] %s168_s29 }
   0xd   :  { %v51_v3 = vld [vmem:[%s316_s2] sm:$0xff]  ;;  %181 = vmatpush.xpose.msk.msra.mxu1 %vm53_vm0, %v50_v2  ;;  %s166_s2 = sshll.u32 %s273_s0, 4  ;;  %vm159_vm7 = vcmask 58369   ;;  %s167_s2 = int_to_ptr.vmem [resolvable:$true] %s166_s2 }
   0xe   :  { %105 = vperm.xlu0 %187, %v51_v3  }
   0xf   :  { %180 = vmatmul.msk.f32.vlgmr.msra.gmra.mxu0 %vm53_vm0, %v49_v1 }
  0x10   :  { %182 = vmatmul.msk.f32.vlgmr.msra.gmra.mxu1 %vm53_vm0, %v49_v1 }
  0x80   :  { %v106_v4 = vpop.permute.xlu0 %105 }
  0x8c   :  { %v77_v5 = vpop.f32.mrf.mxu0 }
  0x8d   :  { %v100_v6 = vpop.f32.mrf.mxu1  ;;  %v108_v7 = vsub.f32 %v106_v4, %v77_v5 }
  0x8e   :  { %v117_v8 = vsub.f32 %v106_v4, %v100_v6 }
  0x8f   :  { %v110_v9 = vsel %vm109_vm1, %v108_v7, -inf }
  0x90   :  { %v118_v10 = vsel %vm109_vm1, %v117_v8, inf  ;;  %v111_v11 = vrot.slane %v110_v9, 4 }
  0x91   :  { %v119_v12 = vrot.slane %v118_v10, 4 }
  0x92   :  { %v112_v13 = vmax.f32 %v110_v9, %v111_v11 }
  0x93   :  { %v120_v14 = vmin.f32 %v118_v10, %v119_v12 }
  0x94   :  { %v113_v15 = vrot.slane %v112_v13, 2 }
  0x95   :  { %v121_v16 = vrot.slane %v120_v14, 2 }
  0x96   :  { %v114_v17 = vmax.f32 %v112_v13, %v113_v15 }
  0x97   :  { %v122_v18 = vmin.f32 %v120_v14, %v121_v16 }
  0x98   :  { %v115_v19 = vrot.slane %v114_v17, 1 }
  0x99   :  { %v123_v20 = vrot.slane %v122_v18, 1 }
  0x9a   :  { %v116_v22 = vmax.f32 %v114_v17, %v115_v19 }
  0x9b   :  { %v124_v23 = vmin.f32 %v122_v18, %v123_v20 }
  0x9c   :  { %v125_v24 = vadd.f32 %v116_v22, %v52_v21 }
  0x9d   :  { %v140_v25 = vadd.f32 %v124_v23, %v52_v21 }
  0x9e   :  { %v126_v26 = vmul.f32 2.0, %v125_v24 }
  0x9f   :  { %v141_v27 = vmul.f32 2.0, %v140_v25 }
  0xa0   :  { %v127_v28 = vmax.f32 %v126_v26, 0.0 }
  0xa1   :  { %v142_v29 = vmax.f32 %v141_v27, 0.0 }
  0xa2   :  { %vm135_vm4 = vcmp.eq.f32.partialorder %v127_v28, inf  ;;  %v138_v45 = vand.u32 2147483648, %v127_v28  ;;  %vm137_vm6 = vcmp.eq.f32.partialorder %v127_v28, 0.0 }
  0xa3   :  { %188 = vrsqrt.f32 %v142_v29  ;;  %vm150_vm2 = vcmp.eq.f32.partialorder %v142_v29, inf  ;;  %v153_v44 = vand.u32 2147483648, %v142_v29  ;;  %vm152_vm5 = vcmp.eq.f32.partialorder %v142_v29, 0.0 }
  0xa4   :  { %190 = vrsqrt.f32 %v127_v28 }
  0xa9   :  { %v189_v30 = vpop.eup %188 }
  0xaa   :  { %v191_v31 = vpop.eup %190  ;;  %v144_v32 = vmul.f32 %v189_v30, %v142_v29 }
  0xab   :  { %v129_v33 = vmul.f32 %v191_v31, %v127_v28 }
  0xac   :  { %v145_v34 = vmul.f32 %v189_v30, %v144_v32 }
  0xad   :  { %v130_v35 = vmul.f32 %v191_v31, %v129_v33 }
  0xae   :  { %v146_v36 = vmul.f32 0.5, %v145_v34 }
  0xaf   :  { %v131_v37 = vmul.f32 0.5, %v130_v35 }
  0xb0   :  { %v147_v38 = vsub.f32 1.5, %v146_v36 }
  0xb1   :  { %v132_v39 = vsub.f32 1.5, %v131_v37 }
  0xb2   :  { %v148_v40 = vmul.f32 %v189_v30, %v147_v38 }
  0xb3   :  { %v133_v41 = vmul.f32 %v191_v31, %v132_v39 }
  0xb4   :  { %v149_v42 = vmul.f32 %v148_v40, %v142_v29 }
  0xb5   :  { %v134_v43 = vmul.f32 %v133_v41, %v127_v28 }
  0xb6   :  { %v151_v46 = vsel %vm150_vm2, %v142_v29, %v149_v42 }
  0xb7   :  { %v136_v47 = vsel %vm135_vm4, %v127_v28, %v134_v43  ;;  %v154_v48 = vsel %vm152_vm5, %v153_v44, %v151_v46 }
  0xb8   :  { %v139_v49 = vsel %vm137_vm6, %v138_v45, %v136_v47  ;;  %v155_v50 = vsub.f32 100.0, %v154_v48 }
  0xb9   :  { %158 = vst.msk [vmem:[#allocation7] sm:$0x1] %vm157_vm3, %v139_v49 }
  0xba   :  { %v156_v51 = vmax.f32 %v155_v50, 0.0 }
  0xbc   :  { %160 = vst.msk [vmem:[#allocation7] sm:$0x2] %vm159_vm7, %v156_v51 }
  0xbd   :  { %171 = dma.vmem_to_hbm [thread:$0]  %s167_s2, 32, %s169_s29, [#allocation4]  }
  0xbe   :  { %268 = dma.done.wait [#allocation4], 32  }
  0xbf   :  { %269 = vsyncadd [#allocation4], 4294967264 }
  0xc0   :  { %176 = vsyncpa [#allocation3], 1 }
  0xc1   :  { %177 = vsyncpa [#allocation6], 1 }
  0xc2   :  { %178 = vsyncpa [#allocation4], 1 }

</bundles_post_ra>
